<compile_context>
chip_gen: v6e
topology: v6e:2x2x1
jax: 0.10.0
libtpu: 0.0.40
codegen_flags: <defaults>
</compile_context>

<pallas_src>
import functools
import math

import jax
import jax.numpy as jnp
from jax import lax
from jax.experimental import pallas as pl
from jax.experimental.pallas import tpu as pltpu


def _round_up(n, m):
    return ((n + m - 1) // m) * m


# ---------------------------------------------------------------------------
# Generation-aware VMEM budget (v5e/v6e: 128 MiB physical, v7x: 64 MiB).
# ---------------------------------------------------------------------------
@functools.lru_cache(maxsize=1)
def _vmem_budget():
    cap = None
    try:
        info = pltpu.get_tpu_info()
        for name in ("vmem_capacity_bytes", "vmem_size_bytes", "vmem_bytes"):
            v = getattr(info, name, None)
            if v:
                cap = int(v)
                break
    except Exception:
        cap = None
    if cap is None:
        cap = 64 * 1024 * 1024            # conservative: assume v7x
    return int(min(cap * 0.85, 100 * 1024 * 1024))


# ---------------------------------------------------------------------------
# Capability probe: can constant-index blocks be single-buffered?
# ---------------------------------------------------------------------------
_SINGLE_BUF_OK = None


def _single_buffer_ok():
    global _SINGLE_BUF_OK
    if _SINGLE_BUF_OK is None:
        try:
            def k(x_ref, o_ref):
                o_ref[...] = x_ref[...] + 1.0

            f = pl.pallas_call(
                k,
                out_shape=jax.ShapeDtypeStruct((8, 128), jnp.float32),
                grid=(2,),
                in_specs=[pl.BlockSpec((8, 128), lambda i: (0, 0),
                                       pipeline_mode=pl.Buffered(1))],
                out_specs=pl.BlockSpec((8, 128), lambda i: (0, 0)),
            )
            jax.block_until_ready(f(jnp.zeros((8, 128), jnp.float32)))
            _SINGLE_BUF_OK = True
        except Exception:
            _SINGLE_BUF_OK = False
    return _SINGLE_BUF_OK


def _const_block(shape, index_map):
    """Spec for a block whose index never changes (weights / biases).

    Single-buffer it when pl.Buffered(1) is supported (halves resident-weight
    VMEM, the thing that blows v7x's 64 MiB at large E); otherwise default.
    """
    if _single_buffer_ok():
        try:
            return pl.BlockSpec(shape, index_map, pipeline_mode=pl.Buffered(1))
        except Exception:
            pass
    return pl.BlockSpec(shape, index_map)


def _weight_buf_factor():
    return 1 if _single_buffer_ok() else 2


# ---------------------------------------------------------------------------
# Tile-size selection
# ---------------------------------------------------------------------------
def _pick_row_tile(total_rows, in_cols, out_cols, weight_bytes, budget,
                   max_rows=2048):
    """Largest multiple-of-8 divisor of total_rows whose streamed bf16,
    double-buffered in/out windows fit the budget.  Independent of the
    recurrence time chunk (projections are pure HBM-streaming matmuls)."""
    per_row = 2 * 2 * in_cols + 2 * 2 * out_cols     # 2 buffers x bf16 bytes
    avail = max(budget - weight_bytes, per_row * 8)
    cap = min(total_rows, max_rows, avail // per_row)
    cap = max(8, (cap // 8) * 8)
    best = 8
    r = 8
    while r <= cap:
        if total_rows % r == 0:
            best = r
        r += 8
    return best


def _pick_time_chunk(S, Bp, E, budget):
    """Recurrence time-chunk length from the VMEM budget (bf16 gate / hidden
    streams, fp32 carries).  S is later padded up to a multiple of it."""
    wf = _weight_buf_factor()
    fixed = wf * E * 8 * E * 2               # resident W_hh (E, 8E) bf16
    fixed += 2 * (2 * Bp) * E * 4            # h / c scratch, fp32
    fixed += 2 * 2 * Bp * E * 4              # hn outputs, double-buffered fp32
    per_ts = 2 * 2 * Bp * 4 * E * 2          # gf + gb chunks, 2 buffers, bf16
    per_ts += 2 * 2 * Bp * E * 2             # hs_f + hs_b chunks, 2 buf, bf16
    avail = max(budget - fixed, per_ts)
    ts = int(avail // per_ts)
    return max(1, min(ts, 256, S))


# ---------------------------------------------------------------------------
# Gate reordering: PyTorch packs gates as [i, f, g, o]; we repack to
# [i, f, o, g] so one sigmoid covers a contiguous 3E slab and one tanh the
# last E slab inside the recurrence.
# ---------------------------------------------------------------------------
def _reorder_gates(w, axis=0):
    i, f, g, o = jnp.split(w, 4, axis=axis)
    return jnp.concatenate([i, f, o, g], axis=axis)


# ---------------------------------------------------------------------------
# Kernel 1: input projections (dense row-tiled MXU matmuls, hoisted out of the
# recurrence).  gf / gb = gates_x for the forward / backward direction.
# bf16 operands, fp32 accumulation, bf16 streamed outputs.
# ---------------------------------------------------------------------------
def _proj1_kernel(x_ref, w_ref, b_ref, gf_ref, gb_ref, *, gate_w):
    g = (jnp.dot(x_ref[...], w_ref[...], preferred_element_type=jnp.float32)
         + b_ref[...])
    gf_ref[...] = g[:, :gate_w].astype(gf_ref.dtype)
    gb_ref[...] = g[:, gate_w:].astype(gb_ref.dtype)


def _proj2_kernel(hf_ref, hb_ref, wf_ref, wb_ref, b_ref, gf_ref, gb_ref, *,
                  gate_w):
    g = (jnp.dot(hf_ref[...], wf_ref[...], preferred_element_type=jnp.float32)
         + jnp.dot(hb_ref[...], wb_ref[...], preferred_element_type=jnp.float32)
         + b_ref[...])
    gf_ref[...] = g[:, :gate_w].astype(gf_ref.dtype)
    gb_ref[...] = g[:, gate_w:].astype(gb_ref.dtype)


def input_projection_first(x2, w_cat, b_cat, budget):
    R, din = x2.shape
    gate_w = w_cat.shape[1] // 2              # 4E
    w_bytes = _weight_buf_factor() * (w_cat.size * 2 + b_cat.size * 4)
    tile = _pick_row_tile(R, in_cols=din, out_cols=2 * gate_w,
                          weight_bytes=w_bytes, budget=budget // 2)
    kernel = functools.partial(_proj1_kernel, gate_w=gate_w)
    return pl.pallas_call(
        kernel,
        out_shape=(jax.ShapeDtypeStruct((R, gate_w), jnp.bfloat16),
                   jax.ShapeDtypeStruct((R, gate_w), jnp.bfloat16)),
        grid=(R // tile,),
        in_specs=[pl.BlockSpec((tile, din), lambda i: (i, 0)),
                  _const_block((din, 2 * gate_w), lambda i: (0, 0)),
                  _const_block((1, 2 * gate_w), lambda i: (0, 0))],
        out_specs=(pl.BlockSpec((tile, gate_w), lambda i: (i, 0)),
                   pl.BlockSpec((tile, gate_w), lambda i: (i, 0))),
        compiler_params=pltpu.CompilerParams(
            dimension_semantics=("parallel",),
            vmem_limit_bytes=_vmem_budget()),
    )(x2, w_cat, b_cat)


def input_projection_pair(hs_f, hs_b, wf_cat, wb_cat, b_cat, budget):
    R, E = hs_f.shape
    gate_w = wf_cat.shape[1] // 2             # 4E
    w_bytes = _weight_buf_factor() * ((wf_cat.size + wb_cat.size) * 2
                                      + b_cat.size * 4)
    tile = _pick_row_tile(R, in_cols=2 * E, out_cols=2 * gate_w,
                          weight_bytes=w_bytes, budget=budget // 2)
    kernel = functools.partial(_proj2_kernel, gate_w=gate_w)
    return pl.pallas_call(
        kernel,
        out_shape=(jax.ShapeDtypeStruct((R, gate_w), jnp.bfloat16),
                   jax.ShapeDtypeStruct((R, gate_w), jnp.bfloat16)),
        grid=(R // tile,),
        in_specs=[pl.BlockSpec((tile, E), lambda i: (i, 0)),
                  pl.BlockSpec((tile, E), lambda i: (i, 0)),
                  _const_block((E, 2 * gate_w), lambda i: (0, 0)),
                  _const_block((E, 2 * gate_w), lambda i: (0, 0)),
                  _const_block((1, 2 * gate_w), lambda i: (0, 0))],
        out_specs=(pl.BlockSpec((tile, gate_w), lambda i: (i, 0)),
                   pl.BlockSpec((tile, gate_w), lambda i: (i, 0))),
        compiler_params=pltpu.CompilerParams(
            dimension_semantics=("parallel",),
            vmem_limit_bytes=_vmem_budget()),
    )(hs_f, hs_b, wf_cat, wb_cat, b_cat)


# ---------------------------------------------------------------------------
# Kernel 2: fused bidirectional LSTM layer recurrence, streamed over time.
# Grid axis = time chunks ("arbitrary"); (h, c) for BOTH directions live in a
# single (2*Bp, E) fp32 VMEM carry.  Forward chunk t and backward chunk
# (n_chunks-1-t) are processed in the same grid step; each timestep uses ONE
# fused (2*Bp, E) x (E, 8E) MXU matmul and batched nonlinearities.
# ---------------------------------------------------------------------------
def _bilstm_kernel(ml_ref, gf_ref, gb_ref, whh_ref, *refs,
                   ts, batch, hidden, n_chunks, write_seq):
    E = hidden
    if write_seq:
        hsf_ref, hsb_ref, hff_ref, hfb_ref, h_s, c_s = refs
    else:
        hff_ref, hfb_ref, h_s, c_s = refs
        hsf_ref = hsb_ref = None

    t = pl.program_id(0)
    max_len = ml_ref[0]

    @pl.when(t == 0)
    def _init():
        h_s[...] = jnp.zeros_like(h_s)
        c_s[...] = jnp.zeros_like(c_s)

    base_f = t * ts                      # global start time of the fwd chunk
    base_b = (n_chunks - 1 - t) * ts     # global start time of the bwd chunk
    both_dead = jnp.logical_and(base_f >= max_len, base_b >= max_len)

    if write_seq:
        @pl.when(both_dead)
        def _skip():
            # Whole chunk past max_len for both directions: zeros, no compute.
            hsf_ref[...] = jnp.zeros_like(hsf_ref)
            hsb_ref[...] = jnp.zeros_like(hsb_ref)

    @pl.when(jnp.logical_not(both_dead))
    def _run():
        row_ids = lax.broadcasted_iota(jnp.int32, (2 * batch, 1), 0)
        is_fwd = row_ids < batch

        def step(s, carry):
            h, c = carry                              # (2*Bp, E) fp32 carries
            row_f = pl.multiple_of(s * batch, 8)      # fwd local step s
            sr = ts - 1 - s                           # bwd local step
            row_b = pl.multiple_of(sr * batch, 8)
            # streamed input gates (bf16 in HBM/VMEM) for both directions
            gx = jnp.concatenate(
                [gf_ref[pl.ds(row_f, batch), :],
                 gb_ref[pl.ds(row_b, batch), :]], axis=0).astype(jnp.float32)
            # single fused recurrent matmul for both directions
            hh = jnp.dot(h.astype(jnp.bfloat16), whh_ref[...],
                         preferred_element_type=jnp.float32)       # (2B, 8E)
            hh_sel = jnp.concatenate(
                [hh[:batch, :4 * E], hh[batch:, 4 * E:]], axis=0)  # (2B, 4E)
            gates = gx + hh_sel
            # gate order [i | f | o | g]: one sigmoid over 3E, one tanh over E
            sig = jax.nn.sigmoid(gates[:, :3 * E])
            g_g = jnp.tanh(gates[:, 3 * E:])
            c_new = sig[:, E:2 * E] * c + sig[:, :E] * g_g
            h_new = sig[:, 2 * E:3 * E] * jnp.tanh(c_new)
            # mask timesteps >= max_len (emulates x[:, :max_len])
            valid_f = (base_f + s) < max_len
            valid_b = (base_b + sr) < max_len
            valid = jnp.where(is_fwd, valid_f, valid_b)            # (2B, 1)
            h = jnp.where(valid, h_new, h)
            c = jnp.where(valid, c_new, c)
            if write_seq:
                h_out = jnp.where(valid, h_new, 0.0).astype(hsf_ref.dtype)
                hsf_ref[pl.ds(row_f, batch), :] = h_out[:batch]
                hsb_ref[pl.ds(row_b, batch), :] = h_out[batch:]
            return h, c

        carry0 = (h_s[...], c_s[...])
        h, c = lax.fori_loop(0, ts, step, carry0, unroll=min(4, ts))
        h_s[...] = h
        c_s[...] = c

    @pl.when(t == n_chunks - 1)
    def _fin():
        hff_ref[...] = h_s[pl.ds(0, batch), :]
        hfb_ref[...] = h_s[pl.ds(batch, batch), :]


def bilstm_layer(gf, gb, whh_cat, max_len, Sp, Bp, ts, E, *, write_seq,
                 budget):
    rows = ts * Bp
    n_chunks = Sp // ts
    kernel = functools.partial(_bilstm_kernel, ts=ts, batch=Bp, hidden=E,
                               n_chunks=n_chunks, write_seq=write_seq)
    in_specs = [
        pl.BlockSpec((rows, 4 * E), lambda t, ml: (t, 0)),
        pl.BlockSpec((rows, 4 * E), lambda t, ml: (n_chunks - 1 - t, 0)),
        _const_block((E, 8 * E), lambda t, ml: (0, 0)),     # resident W_hh
    ]
    out_shapes, out_specs = [], []
    if write_seq:
        out_shapes += [jax.ShapeDtypeStruct((Sp * Bp, E), jnp.bfloat16)] * 2
        out_specs += [pl.BlockSpec((rows, E), lambda t, ml: (t, 0)),
                      pl.BlockSpec((rows, E), lambda t, ml: (n_chunks - 1 - t, 0))]
    out_shapes += [jax.ShapeDtypeStruct((Bp, E), jnp.float32)] * 2
    out_specs += [pl.BlockSpec((Bp, E), lambda t, ml: (0, 0))] * 2
    grid_spec = pltpu.PrefetchScalarGridSpec(
        num_scalar_prefetch=1,
        grid=(n_chunks,),
        in_specs=in_specs,
        out_specs=tuple(out_specs),
        scratch_shapes=[pltpu.VMEM((2 * Bp, E), jnp.float32)] * 2,
    )
    return pl.pallas_call(
        kernel,
        out_shape=tuple(out_shapes),
        grid_spec=grid_spec,
        compiler_params=pltpu.CompilerParams(
            dimension_semantics=("arbitrary",),
            vmem_limit_bytes=budget),
    )(max_len, gf, gb, whh_cat)


# ---------------------------------------------------------------------------
# Kernel 3: final fully-connected layer (tiny; whole arrays in VMEM)
# ---------------------------------------------------------------------------
def _fc_kernel(x_ref, w_ref, b_ref, o_ref):
    o_ref[...] = (jnp.dot(x_ref[...], w_ref[...],
                          preferred_element_type=jnp.float32) + b_ref[...])


def fc(x, w, b):
    return pl.pallas_call(
        _fc_kernel,
        out_shape=jax.ShapeDtypeStruct((x.shape[0], w.shape[0]), jnp.float32),
        in_specs=[pl.BlockSpec(memory_space=pltpu.MemorySpace.VMEM)] * 3,
        out_specs=pl.BlockSpec(memory_space=pltpu.MemorySpace.VMEM),
        compiler_params=pltpu.CompilerParams(vmem_limit_bytes=_vmem_budget()),
    )(x, jnp.transpose(w), b.reshape(1, -1))


# ---------------------------------------------------------------------------
# Full AWD-LSTM forward (glue in plain JAX, hot paths in Pallas)
# ---------------------------------------------------------------------------
def awd_lstm_forward(params, x, bi_reduce):
    B, S, E = x.shape
    budget = _vmem_budget()

    # max_len reduction in plain XLA; literal torch.max(torch.sum(x != 0, 1))
    max_len = jnp.max(jnp.sum((x != 0).astype(jnp.int32), axis=1))
    max_len = max_len.astype(jnp.int32).reshape((1,))

    Bp = _round_up(max(B, 1), 8)                 # pad batch to sublane multiple
    ts = _pick_time_chunk(S, Bp, E, budget // 2)
    Sp = _round_up(S, ts)                        # pad S so ts always divides it

    xp = jnp.pad(x, ((0, Bp - B), (0, Sp - S), (0, 0)))
    # time-major, flattened: row index = t * Bp + b ; bf16 for the MXU stream
    x2 = jnp.transpose(xp, (1, 0, 2)).reshape(Sp * Bp, E).astype(jnp.bfloat16)

    num_layers = len(params["lstm"])
    lp0 = params["lstm"][0]
    w_cat = jnp.concatenate(
        [jnp.transpose(_reorder_gates(lp0["w_ih"])),
         jnp.transpose(_reorder_gates(lp0["w_ih_r"]))],
        axis=1).astype(jnp.bfloat16)                                 # (E, 8E)
    b_cat = jnp.concatenate(
        [_reorder_gates(lp0["b_ih"] + lp0["b_hh"]),
         _reorder_gates(lp0["b_ih_r"] + lp0["b_hh_r"])]).reshape(1, -1)
    gf, gb = input_projection_first(x2, w_cat, b_cat, budget)

    hf_f = hf_b = None
    for li, lp in enumerate(params["lstm"]):
        whh_cat = jnp.concatenate(
            [jnp.transpose(_reorder_gates(lp["w_hh"])),
             jnp.transpose(_reorder_gates(lp["w_hh_r"]))],
            axis=1).astype(jnp.bfloat16)                             # (E, 8E)
        last = li == num_layers - 1
        outs = bilstm_layer(gf, gb, whh_cat, max_len, Sp, Bp, ts, E,
                            write_seq=not last, budget=budget)
        if last:
            hf_f, hf_b = outs        # last layer: no full-sequence writeback
        else:
            hs_f, hs_b, hf_f, hf_b = outs
            nxt = params["lstm"][li + 1]
            # split the (4E, 2E) input weights so no (S,B,2E) concat is needed
            wf_cat = jnp.concatenate(
                [jnp.transpose(_reorder_gates(nxt["w_ih"][:, :E])),
                 jnp.transpose(_reorder_gates(nxt["w_ih_r"][:, :E]))],
                axis=1).astype(jnp.bfloat16)
            wb_cat = jnp.concatenate(
                [jnp.transpose(_reorder_gates(nxt["w_ih"][:, E:])),
                 jnp.transpose(_reorder_gates(nxt["w_ih_r"][:, E:]))],
                axis=1).astype(jnp.bfloat16)
            b_cat = jnp.concatenate(
                [_reorder_gates(nxt["b_ih"] + nxt["b_hh"]),
                 _reorder_gates(nxt["b_ih_r"] + nxt["b_hh_r"])]).reshape(1, -1)
            gf, gb = input_projection_pair(hs_f, hs_b, wf_cat, wb_cat, b_cat,
                                           budget)

    hf_f = hf_f[:B]                     # drop batch padding
    hf_b = hf_b[:B]
    last2 = jnp.stack([hf_f, hf_b], axis=0)          # hn[-2:] : (2, B, E)

    if bi_reduce == "concat":
        red = jnp.transpose(last2, (1, 0, 2)).reshape(B, 2 * E)
    elif bi_reduce == "max":
        red = jnp.max(last2, axis=0)
    elif bi_reduce == "mean":
        red = jnp.mean(last2, axis=0)
    elif bi_reduce == "last":
        red = last2[-1]
    else:
        raise ValueError(f"unknown bi_reduce: {bi_reduce}")

    return fc(red, params["fc_w"], params["fc_b"])


# ---------------------------------------------------------------------------
# Deterministic parameter initialization (PyTorch-style U(-1/sqrt(E), 1/sqrt(E)))
# ---------------------------------------------------------------------------
def init_params(key, embedding_size, num_layers):
    E = embedding_size
    k = 1.0 / math.sqrt(E)

    def u(kk, shape):
        return jax.random.uniform(kk, shape, jnp.float32, -k, k)

    keys = jax.random.split(key, num_layers * 8 + 2)
    idx = 0
    params = {"lstm": []}
    for layer in range(num_layers):
        din = E if layer == 0 else 2 * E
        lp = {}
        for name, shape in [("w_ih", (4 * E, din)), ("w_hh", (4 * E, E)),
                            ("b_ih", (4 * E,)), ("b_hh", (4 * E,)),
                            ("w_ih_r", (4 * E, din)), ("w_hh_r", (4 * E, E)),
                            ("b_ih_r", (4 * E,)), ("b_hh_r", (4 * E,))]:
            lp[name] = u(keys[idx], shape)
            idx += 1
        params["lstm"].append(lp)
    params["fc_w"] = u(keys[idx], (E, E)); idx += 1
    params["fc_b"] = u(keys[idx], (E,))
    return params


if __name__ == "__main__":
    E, L, B, S = 32, 2, 2, 8
    key = jax.random.PRNGKey(0)
    pkey, xkey = jax.random.split(key)
    params = init_params(pkey, E, L)

    x = jax.random.normal(xkey, (B, S, E), jnp.float32)
    # simulate padded sequences: batch 0 has 6 valid steps, batch 1 has 7
    valid_lens = jnp.array([6, 7])
    mask = (jnp.arange(S)[None, :] < valid_lens[:, None]).astype(jnp.float32)
    x = x * mask[:, :, None]

    out = awd_lstm_forward(params, x, bi_reduce="mean")
    out = jax.block_until_ready(out)
    assert out.shape == (B, E) and out.dtype == jnp.float32
    print("KERNEL_OK")
</pallas_src>

<mosaic_0001>
module attributes {stable_mosaic.version = 11 : i64} {
  func.func @k(%arg0: i32, %arg1: memref<8x128xf32, #tpu.memory_space<vmem>>, %arg2: memref<8x128xf32, #tpu.memory_space<vmem>>) attributes {dimension_semantics = [#tpu.dimension_semantics<arbitrary>], iteration_bounds = array<i64: 2>, scalar_prefetch = 0 : i64, scratch_operands = 0 : i64, tpu.core_type = #tpu.core_type<tc>, window_params = [{pipeline_mode = #tpu.pipeline_mode<synchronous>, transform_indices = @transform_0, window_bounds = array<i64: 8, 128>}, {pipeline_mode = #tpu.pipeline_mode<synchronous>, transform_indices = @transform_1, window_bounds = array<i64: 8, 128>}]} {
    %c0 = arith.constant 0 : index
    %c0_0 = arith.constant 0 : index
    %0 = vector.load %arg1[%c0, %c0_0] : memref<8x128xf32, #tpu.memory_space<vmem>>, vector<8x128xf32>
    %cst = arith.constant 1.000000e+00 : f32
    %1 = vector.broadcast %cst : f32 to vector<8x128xf32>
    %2 = arith.addf %0, %1 : vector<8x128xf32>
    %c0_1 = arith.constant 0 : index
    %c0_2 = arith.constant 0 : index
    %3 = vector.load %arg2[%c0_1, %c0_2] : memref<8x128xf32, #tpu.memory_space<vmem>>, vector<8x128xf32>
    tpu.vector_store %arg2[%c0_1, %c0_2], %2 {strides = array<i32>} : memref<8x128xf32, #tpu.memory_space<vmem>>, vector<8x128xf32>,
    return
  }
  func.func @transform_0(%arg0: i32) -> (i32, i32) {
    %c0_i32 = arith.constant 0 : i32
    %c0_i32_0 = arith.constant 0 : i32
    %c0_i32_1 = arith.constant 0 : i32
    return %c0_i32, %c0_i32_0 : i32, i32
  }
  func.func @transform_1(%arg0: i32) -> (i32, i32) {
    %c0_i32 = arith.constant 0 : i32
    %c0_i32_0 = arith.constant 0 : i32
    %c0_i32_1 = arith.constant 0 : i32
    return %c0_i32, %c0_i32_0 : i32, i32
  }
}

module attributes {stable_mosaic.version = 11 : i64} {
  func.func @_proj1_kernel(%arg0: i32, %arg1: memref<64x32xbf16, #tpu.memory_space<vmem>>, %arg2: memref<32x256xbf16, #tpu.memory_space<vmem>>, %arg3: memref<1x256xf32, #tpu.memory_space<vmem>>, %arg4: memref<64x128xbf16, #tpu.memory_space<vmem>>, %arg5: memref<64x128xbf16, #tpu.memory_space<vmem>>) attributes {dimension_semantics = [#tpu.dimension_semantics<parallel>], iteration_bounds = array<i64: 1>, scalar_prefetch = 0 : i64, scratch_operands = 0 : i64, tpu.core_type = #tpu.core_type<tc>, window_params = [{transform_indices = @transform_0, window_bounds = array<i64: 64, 32>}, {pipeline_mode = #tpu.pipeline_mode<synchronous>, transform_indices = @transform_1, window_bounds = array<i64: 32, 256>}, {pipeline_mode = #tpu.pipeline_mode<synchronous>, transform_indices = @transform_2, window_bounds = array<i64: 1, 256>}, {transform_indices = @transform_3, window_bounds = array<i64: 64, 128>}, {transform_indices = @transform_4, window_bounds = array<i64: 64, 128>}]} {
    %c0 = arith.constant 0 : index
    %c0_0 = arith.constant 0 : index
    %0 = vector.load %arg1[%c0, %c0_0] : memref<64x32xbf16, #tpu.memory_space<vmem>>, vector<64x32xbf16>
    %c0_1 = arith.constant 0 : index
    %c0_2 = arith.constant 0 : index
    %1 = vector.load %arg2[%c0_1, %c0_2] : memref<32x256xbf16, #tpu.memory_space<vmem>>, vector<32x256xbf16>
    %cst = arith.constant dense<0.000000e+00> : vector<64x256xf32>
    %2 = tpu.matmul %0, %1, %cst {dimension_numbers = #tpu.dot_dimension_numbers<[1], [0], [0], [1], [0, 0, 1, 1], [], []>} : vector<64x32xbf16>, vector<32x256xbf16>, vector<64x256xf32> -> vector<64x256xf32>
    %c0_3 = arith.constant 0 : index
    %c0_4 = arith.constant 0 : index
    %3 = vector.load %arg3[%c0_3, %c0_4] : memref<1x256xf32, #tpu.memory_space<vmem>>, vector<1x256xf32>
    %4 = vector.broadcast %3 : vector<1x256xf32> to vector<64x256xf32>
    %5 = arith.addf %2, %4 : vector<64x256xf32>
    %6 = vector.extract_strided_slice %5 {offsets = [0, 0], sizes = [64, 128], strides = [1, 1]} : vector<64x256xf32> to vector<64x128xf32>
    %7 = arith.truncf %6 : vector<64x128xf32> to vector<64x128xbf16>
    %c0_5 = arith.constant 0 : index
    %c0_6 = arith.constant 0 : index
    %8 = vector.load %arg4[%c0_5, %c0_6] : memref<64x128xbf16, #tpu.memory_space<vmem>>, vector<64x128xbf16>
    tpu.vector_store %arg4[%c0_5, %c0_6], %7 {strides = array<i32>} : memref<64x128xbf16, #tpu.memory_space<vmem>>, vector<64x128xbf16>,
    %9 = vector.extract_strided_slice %5 {offsets = [0, 128], sizes = [64, 128], strides = [1, 1]} : vector<64x256xf32> to vector<64x128xf32>
    %10 = arith.truncf %9 : vector<64x128xf32> to vector<64x128xbf16>
    %c0_7 = arith.constant 0 : index
    %c0_8 = arith.constant 0 : index
    %11 = vector.load %arg5[%c0_7, %c0_8] : memref<64x128xbf16, #tpu.memory_space<vmem>>, vector<64x128xbf16>
    tpu.vector_store %arg5[%c0_7, %c0_8], %10 {strides = array<i32>} : memref<64x128xbf16, #tpu.memory_space<vmem>>, vector<64x128xbf16>,
    return
  }
  func.func @transform_0(%arg0: i32) -> (i32, i32) {
    %c0_i32 = arith.constant 0 : i32
    %c0_i32_0 = arith.constant 0 : i32
    return %arg0, %c0_i32 : i32, i32
  }
  func.func @transform_1(%arg0: i32) -> (i32, i32) {
    %c0_i32 = arith.constant 0 : i32
    %c0_i32_0 = arith.constant 0 : i32
    %c0_i32_1 = arith.constant 0 : i32
    return %c0_i32, %c0_i32_0 : i32, i32
  }
  func.func @transform_2(%arg0: i32) -> (i32, i32) {
    %c0_i32 = arith.constant 0 : i32
    %c0_i32_0 = arith.constant 0 : i32
    %c0_i32_1 = arith.constant 0 : i32
    return %c0_i32, %c0_i32_0 : i32, i32
  }
  func.func @transform_3(%arg0: i32) -> (i32, i32) {
    %c0_i32 = arith.constant 0 : i32
    %c0_i32_0 = arith.constant 0 : i32
    return %arg0, %c0_i32 : i32, i32
  }
  func.func @transform_4(%arg0: i32) -> (i32, i32) {
    %c0_i32 = arith.constant 0 : i32
    %c0_i32_0 = arith.constant 0 : i32
    return %arg0, %c0_i32 : i32, i32
  }
}

</mosaic_0001>

<bundles_post_ra>
// kernel: tpu_custom_call.1
= control target key start
LH: loop header
LB: loop body
LE: loop exit
PB: predicated region body
PF: predicated region fallthrough
CT: control target
= control target key end

     0   :  { %6 = vsyncpa [#allocation3], 0  ;;  %s305_s0 = inlined_call_operand.hbm [shape: f32[8,128], index: 0, kind: input, shape index: {}]   ;;  %s306_s1 = inlined_call_operand.hbm [shape: f32[8,128], index: 1, kind: output, shape index: {}]  }
   0x1   :  { %7 = vsyncpa [#allocation4], 0  ;;  %s258_s6 = smov 0  }
   0x2 LB: > { %s145_s7 = sadd.s32 4294967295, %s244_s6   ;;  %p146_p0 = scmp.ge.s32.totalorder %s244_s6, 1  ;;  %s244_s6 = sphi %s258_s6, %s13_s6  }
   0x3   : > { %p60_p1 = scmp.lt.s32.totalorder %s244_s6, 3  ;;  %p270_p3 = scmp.eq.s32.totalorder %s145_s7, 0 }
   0x4   : > { %s246_s10 = smov [#allocation2]  }
   0x5   : > { %p266_p2 = pnand %p146_p0, %p60_p1  ;;  %s73_s11 = sshll.u32 %s246_s10, 4  ;;  %s74_s11 = int_to_ptr.vmem [resolvable:$true] %s73_s11 }
   0x6   : > { %s191_s12 = scalar_lea.vmem %s74_s11, 128  ;;  %p199_p10 = scmp.lt.s32.totalorder %s74_s11, %s74_s11 }
   0x7   : > { %p162_p4 = pneg %p266_p2  ;;  %p192_p7 = scmp.ne.s32.totalorder %s74_s11, %s191_s12 }
   0x8   : > { %p200_p11 = scmp.lt.s32.totalorder %s191_s12, %s191_s12 }
   0x9   : > { %p163_p5 = pnand %p270_p3, %p162_p4 }
   0xa   : > { %p201_p12 = por %p200_p11, %p199_p10 }
   0xb   : > { %p182_p6 = pneg %p163_p5 }
   0xd   : > { %p194_p8 = pnand %p192_p7, %p182_p6 }
   0xf   : > { %p195_p9 = pneg %p194_p8 }
  0x11   : > { %p202_p13 = pnand %p201_p12, %p195_p9 }
  0x13   : > { %205 = shalt.err (!%p202_p13)
}
  0x14   : > { %165 = dma.hbm_to_vmem [thread:$0]  (!%p163_p5), %s305_s0, 128, %s74_s11, [#allocation3]  }
  0x15   : > { %86 = sbr.rel (%p266_p2) target bundleno = 42 (0x2a), region = 24 }
  0x1a   : > { %235 = dma.done.wait (%p270_p3), [#allocation3], 128  }
  0x1b   : > { %237 = vsyncadd (%p270_p3), [#allocation3], 4294967168  ;;  %s247_s15 = smov [#allocation5]   ;;  %v96_v0 = vld [vmem:[#allocation2] sm:$0xff]  ;;  %p287_p0 = scmp.eq.s32.totalorder %s145_s7, 1 }
  0x1c   : > { %s106_s16 = sshll.u32 %s247_s15, 4  ;;  %v97_v1 = vadd.f32 1.0, %v96_v0  ;;  %s107_s16 = int_to_ptr.vmem [resolvable:$true] %s106_s16 }
  0x1d   : > { %s206_s18 = scalar_lea.vmem %s107_s16, 128  ;;  %p213_p5 = scmp.lt.s32.totalorder %s107_s16, %s107_s16 }
  0x1e   : > { %98 = vst [vmem:[#allocation5] sm:$0xff] %v97_v1  ;;  %p207_p1 = scmp.ne.s32.totalorder %s107_s16, %s206_s18  ;;  %p214_p6 = scmp.lt.s32.totalorder %s206_s18, %s206_s18 }
  0x20   : > { %p208_p2 = pnand %p207_p1, %p287_p0  ;;  %p215_p7 = por %p214_p6, %p213_p5 }
  0x22   : > { %p209_p4 = pneg %p208_p2 }
  0x24   : > { %p216_p3 = pnand %p215_p7, %p209_p4 }
  0x26   : > { %219 = shalt.err (!%p216_p3)
}
  0x27   : > { %159 = dma.vmem_to_hbm [thread:$0]  (%p287_p0), %s107_s16, 128, %s306_s1, [#allocation4]  }
  0x28   : > { %239 = dma.done.wait (%p287_p0), [#allocation4], 128  }
  0x29   : > { %241 = vsyncadd (%p287_p0), [#allocation4], 4294967168 }
  0x2a PF: > { %s13_s6 = sadd.s32 1, %s244_s6  }
  0x2b   : > { %p10_p8 = scmp.ge.s32.totalorder %s13_s6, 4  }
  0x2d   :  { %12 = sbr.rel (!%p10_p8) target bundleno = 2 (0x2), region = 53 }
  0x32   :  { %119 = vsyncpa [#allocation3], 1 }
  0x33   :  { %121 = vsyncpa [#allocation3 + $0x1], 1 }
  0x34   :  { %122 = vsyncpa [#allocation4], 1 }
  0x35   :  { %124 = vsyncpa [#allocation4 + $0x1], 1 }

// kernel: tpu_custom_call.1
= control target key start
LH: loop header
LB: loop body
LE: loop exit
PB: predicated region body
PF: predicated region fallthrough
CT: control target
= control target key end

     0   :  { %10 = vsyncpa [#allocation3], 0  ;;  %v434_v2 = vmov 0   ;;  %vm83_vm0 = vcmask 261120   ;;  %s497_s0 = inlined_call_operand.vmem [shape: bf16[64,32], index: 0, kind: input, shape index: {}]   ;;  %s498_s1 = inlined_call_operand.vmem [shape: bf16[32,256], index: 1, kind: input, shape index: {}]   ;;  %s499_s2 = inlined_call_operand.vmem [shape: f32[1,256], index: 2, kind: input, shape index: {}]   ;;  %s500_s3 = inlined_call_operand.hbm [shape: bf16[64,128], index: 3, kind: output, shape index: {0}]   ;;  %s501_s4 = inlined_call_operand.hbm [shape: bf16[64,128], index: 4, kind: output, shape index: {1}]  }
   0x1   :  { %v380_v0 = vld [vmem:[%s498_s1 + $0x14] ss:$8 sps:$4 sm:$0xff]   ;;  %v382_v1 = vld [vmem:[%s498_s1 + $0x10] ss:$8 sps:$4 sm:$0xff]   ;;  %128 = vmatprep.mubr.bf16.mxu0 %v434_v2  ;;  %148 = vmatprep.mubr.bf16.mxu1 %v434_v2  ;;  %v383_v3 = vld [vmem:[%s498_s1 + $0x4] ss:$8 sps:$4 sm:$0xff]  }
   0x2   :  { %108 = vmatprep.subr.bf16.mxu0 %v380_v0  ;;  %371 = vmatprep.subr.bf16.mxu1 %v380_v0  ;;  %v385_v4 = vld [vmem:[%s498_s1] ss:$8 sps:$4 sm:$0xff]   ;;  %v387_v6 = vld [vmem:[%s497_s0 + $0x10] sm:$0xff]  }
   0x3   :  { %109 = vmatpush1.bf16.msra.mxu0 %v382_v1  ;;  %373 = vmatpush1.bf16.msra.mxu1 %v382_v1  ;;  %v386_v5 = vld [vmem:[%s497_s0] sm:$0xff]  }
   0x4   :  { %110 = vmatprep.subr.bf16.mxu0 %v383_v3  ;;  %372 = vmatprep.subr.bf16.mxu1 %v383_v3 }
   0x7   :  { %111 = vmatpush1.bf16.msra.mxu0 %v385_v4  ;;  %374 = vmatpush1.bf16.msra.mxu1 %v385_v4 }
   0x8   :  { %11 = vsyncpa [#allocation5], 0  ;;  %v388_v7 = vld [vmem:[%s497_s0 + $0x8] sm:$0xff]   ;;  %v389_v8 = vld [vmem:[%s497_s0 + $0x18] sm:$0xff]   ;;  %v33_v9 = vlaneseq  ;;  %s435_s0 = smov [#allocation2]   ;;  %s436_s6 = smov [#allocation4]  }
   0x9   :  { %v31_v12 = vld [vmem:[%s499_s2] sm:$0x3]  ;;  %s254_s2 = sshll.u32 %s435_s0, 4  ;;  %s266_s7 = sshll.u32 %s436_s6, 4  ;;  %s255_s2 = int_to_ptr.vmem [resolvable:$true] %s254_s2  ;;  %s267_s7 = int_to_ptr.vmem [resolvable:$true] %s266_s7 }
   0xa   :  { %289 = vmatmul.mubr.msk.bf16.vlgmr.msra.gmra.mxu0 %vm83_vm0, %v386_v5  ;;  %291 = vmatmul.mubr.msk.bf16.vlgmr.msra.gmra.mxu1 %vm83_vm0, %v387_v6  ;;  %v34_v10 = vshrl.u32 %v33_v9, 7  ;;  %s390_s8 = scalar_lea.vmem %s255_s2, 512  ;;  %p395_p1 = scmp.lt.s32.totalorder %s255_s2, %s255_s2 }
   0xb   :  { %138 = vmatprep.mubr.bf16.mxu0 %v434_v2  ;;  %158 = vmatprep.mubr.bf16.mxu1 %v434_v2  ;;  %p391_p0 = scmp.ne.s32.totalorder %s255_s2, %s390_s8  ;;  %p396_p2 = scmp.lt.s32.totalorder %s390_s8, %s390_s8 }
   0xc   :  { %v35_v11 = vsub.s32 0, %v34_v10  ;;  %v39_v13 = vsub.s32 1, %v34_v10 }
   0xd   :  { %p397_p3 = por %p396_p2, %p395_p1 }
   0xe   :  { %v36_v16 = vrot.slane %v31_v12, %v35_v11  ;;  %v40_v17 = vrot.slane %v31_v12, %v39_v13 }
   0xf   :  { %p398_p4 = pnand %p397_p3, %p391_p0 }
  0x12   :  { %290 = vmatmul.mubr.msk.bf16.gmra.mxu0 %vm83_vm0, %v388_v7  ;;  %292 = vmatmul.mubr.msk.bf16.gmra.mxu1 %vm83_vm0, %v389_v8 }
  0xca   :  { %v130_v14 = vpop.f32.mrf.mxu0  ;;  %v150_v15 = vpop.f32.mrf.mxu1 }
  0xcb   :  { %v131_v22 = vadd.f32 %v130_v14, %v36_v16  ;;  %v151_v23 = vadd.f32 %v150_v15, %v36_v16 }
  0xcc   :  { %v132_v18 = vpop.f32.mrf.mxu0  ;;  %v152_v19 = vpop.f32.mrf.mxu1 }
  0xcd   :  { %v133_v26 = vadd.f32 %v132_v18, %v40_v17  ;;  %v153_v27 = vadd.f32 %v152_v19, %v40_v17 }
  0xce   :  { %v134_v20 = vpop.f32.mrf.mxu0  ;;  %v154_v21 = vpop.f32.mrf.mxu1 }
  0xcf   :  { %v135_v24 = vadd.f32 %v134_v20, %v36_v16  ;;  %v155_v25 = vadd.f32 %v154_v21, %v36_v16 }
  0xd0   :  { %v136_v28 = vpop.f32.mrf.mxu0  ;;  %v156_v29 = vpop.f32.mrf.mxu1 }
  0xd1   :  { %v328_v30 = vpack.c.bf16 %v135_v24, %v131_v22  ;;  %v338_v31 = vpack.c.bf16 %v155_v25, %v151_v23  ;;  %v137_v32 = vadd.f32 %v136_v28, %v40_v17  ;;  %v157_v33 = vadd.f32 %v156_v29, %v40_v17 }
  0xd2   :  { %v140_v34 = vpop.f32.mrf.mxu0  ;;  %v160_v35 = vpop.f32.mrf.mxu1 }
  0xd3   :  { %329 = vst [vmem:[#allocation2] sm:$0xff] %v328_v30   ;;  %366 = vst [vmem:[#allocation2 + $0x10] sm:$0xff] %v338_v31   ;;  %v348_v36 = vpack.c.bf16 %v137_v32, %v133_v26  ;;  %v358_v37 = vpack.c.bf16 %v157_v33, %v153_v27  ;;  %v141_v42 = vadd.f32 %v140_v34, %v36_v16 }
  0xd4   :  { %v142_v38 = vpop.f32.mrf.mxu0  ;;  %v162_v39 = vpop.f32.mrf.mxu1  ;;  %v161_v43 = vadd.f32 %v160_v35, %v36_v16 }
  0xd5   :  { %349 = vst [vmem:[#allocation4] sm:$0xff] %v348_v36   ;;  %369 = vst [vmem:[#allocation4 + $0x10] sm:$0xff] %v358_v37   ;;  %v143_v46 = vadd.f32 %v142_v38, %v40_v17  ;;  %v163_v47 = vadd.f32 %v162_v39, %v40_v17 }
  0xd6   :  { %v144_v40 = vpop.f32.mrf.mxu0  ;;  %v164_v41 = vpop.f32.mrf.mxu1 }
  0xd7   :  { %v145_v44 = vadd.f32 %v144_v40, %v36_v16  ;;  %v165_v45 = vadd.f32 %v164_v41, %v36_v16 }
  0xd8   :  { %v146_v48 = vpop.f32.mrf.mxu0  ;;  %v166_v49 = vpop.f32.mrf.mxu1 }
  0xd9   :  { %v333_v50 = vpack.c.bf16 %v145_v44, %v141_v42  ;;  %v343_v51 = vpack.c.bf16 %v165_v45, %v161_v43  ;;  %v147_v52 = vadd.f32 %v146_v48, %v40_v17  ;;  %v167_v53 = vadd.f32 %v166_v49, %v40_v17 }
  0xdb   :  { %365 = vst [vmem:[#allocation2 + $0x8] sm:$0xff] %v333_v50   ;;  %367 = vst [vmem:[#allocation2 + $0x18] sm:$0xff] %v343_v51   ;;  %v353_v54 = vpack.c.bf16 %v147_v52, %v143_v46  ;;  %v363_v55 = vpack.c.bf16 %v167_v53, %v163_v47 }
  0xdc   :  { %401 = shalt.err (!%p398_p4)
}
  0xdd   :  { %s437_s9 = smov 64   ;;  %s438_s10 = smov 4   ;;  %368 = vst [vmem:[#allocation4 + $0x8] sm:$0xff] %v353_v54   ;;  %370 = vst [vmem:[#allocation4 + $0x18] sm:$0xff] %v363_v55  }
  0xde   :  { %260 = dma.vmem_to_hbm [thread:$0]  %s255_s2, 512, %s500_s3, [#allocation3], %s437_s9, %s437_s9, %s438_s10  }
  0xdf   :  { %s410_s13 = scalar_lea.vmem %s267_s7, 512  ;;  %p415_p6 = scmp.lt.s32.totalorder %s267_s7, %s267_s7 }
  0xe0   :  { %p411_p5 = scmp.ne.s32.totalorder %s267_s7, %s410_s13  ;;  %p416_p7 = scmp.lt.s32.totalorder %s410_s13, %s410_s13 }
  0xe2   :  { %p417_p8 = por %p416_p7, %p415_p6 }
  0xe4   :  { %p418_p9 = pnand %p417_p8, %p411_p5 }
  0xe6   :  { %421 = shalt.err (!%p418_p9)
}
  0xe7   :  { %272 = dma.vmem_to_hbm [thread:$0]  %s267_s7, 512, %s501_s4, [#allocation5], %s437_s9, %s437_s9, %s438_s10  }
  0xe8   :  { %430 = dma.done.wait [#allocation3], 512  }
  0xe9   :  { %431 = vsyncadd [#allocation3], 4294966784 }
  0xea   :  { %432 = dma.done.wait [#allocation5], 512  }
  0xeb   :  { %433 = vsyncadd [#allocation5], 4294966784 }
  0xec   :  { %279 = vsyncpa [#allocation3], 1 }
  0xed   :  { %280 = vsyncpa [#allocation5], 1 }

</bundles_post_ra>
